<compile_context>
chip_gen: v5e
topology: v5e:2x2
jax: 0.10.0
libtpu: 0.0.40
codegen_flags: <defaults>
</compile_context>

<pallas_src>
import functools

import jax
import jax.numpy as jnp
from jax.experimental import pallas as pl
from jax.experimental.pallas import tpu as pltpu


# ----------------------------------------------------------------------------
# Pallas kernel: one GCLSTM cell step per grid iteration (t = 0..T-1).
#   in:  x (N,F_in)  s (N,N)  wx (F_in,4*F_out)  wc (K,F_out,4*F_out)
#        b (1,4*F_out)    [gate order along lanes: input, forget, cell, output]
#   out: relu(H) (N,F_out)        scratch: H, C  (N,F_out) f32
# ----------------------------------------------------------------------------
def gclstm_kernel(x_ref, s_ref, wx_ref, wc_ref, b_ref, out_ref, h_ref, c_ref,
                  *, K):
    t = pl.program_id(0)
    F_out = h_ref.shape[-1]

    @pl.when(t == 0)
    def _():  # H, C initialized to zeros (as GCLSTM does when H/C are None)
        h_ref[...] = jnp.zeros_like(h_ref)
        c_ref[...] = jnp.zeros_like(c_ref)

    X = x_ref[...]      # (N, F_in)
    S = s_ref[...]      # (N, N)   scaled Laplacian
    H = h_ref[...]      # (N, F_out)  old hidden state
    C = c_ref[...]      # (N, F_out)  old cell state

    # --- fused 4-gate pre-activation: one lane-dense (N, 4*F_out) tile -----
    Z = jnp.dot(X, wx_ref[...], preferred_element_type=jnp.float32)

    # Chebyshev basis, computed once per step and shared by all gates.
    Z = Z + jnp.dot(H, wc_ref[0], preferred_element_type=jnp.float32)   # T_0
    if K > 1:
        T1 = jnp.dot(S, H, preferred_element_type=jnp.float32)          # T_1
        Z = Z + jnp.dot(T1, wc_ref[1], preferred_element_type=jnp.float32)
        Tm2, Tm1 = H, T1
        for k in range(2, K):                                            # T_k
            T2 = 2.0 * jnp.dot(S, Tm1,
                               preferred_element_type=jnp.float32) - Tm2
            Z = Z + jnp.dot(T2, wc_ref[k],
                            preferred_element_type=jnp.float32)
            Tm2, Tm1 = Tm1, T2

    Z = Z + b_ref[...]   # (1, 4*F_out) broadcast; gate + ChebConv bias folded

    # --- gate nonlinearities & state update (f32 elementwise path) ---------
    i_gate = jax.nn.sigmoid(Z[:, 0 * F_out:1 * F_out])
    f_gate = jax.nn.sigmoid(Z[:, 1 * F_out:2 * F_out])
    c_tilde = jnp.tanh(Z[:, 2 * F_out:3 * F_out])
    o_gate = jax.nn.sigmoid(Z[:, 3 * F_out:4 * F_out])   # uses OLD H (GCLSTM)

    C_new = f_gate * C + i_gate * c_tilde
    H_new = o_gate * jnp.tanh(C_new)

    h_ref[...] = H_new
    c_ref[...] = C_new
    # Output block index is constant across t, so this VMEM-resident block is
    # written back to HBM once at the end; storing relu(H) every step is a
    # cheap elementwise op and avoids relying on final-step-only writes.
    out_ref[...] = jnp.maximum(H_new, 0.0)                # F.relu(H)


def gclstm2_forward(x_seq, s_seq, wx, wc, b, *, K):
    T, N, F_in = x_seq.shape
    F_out = wx.shape[-1]

    # Fuse the 4 gates along the output (lane) axis -- done once in the
    # wrapper, never inside the kernel body.
    #   wx: (4, F_in, F_out)       -> (F_in, 4*F_out)
    #   wc: (4, K, F_out, F_out)   -> (K, F_out, 4*F_out)
    #   b : (4, F_out)             -> (1, 4*F_out)
    wx_big = jnp.transpose(wx, (1, 0, 2)).reshape(F_in, 4 * F_out)
    wc_big = jnp.transpose(wc, (1, 2, 0, 3)).reshape(K, F_out, 4 * F_out)
    b_big = b.reshape(1, 4 * F_out)

    kernel = functools.partial(gclstm_kernel, K=K)
    return pl.pallas_call(
        kernel,
        out_shape=jax.ShapeDtypeStruct((N, F_out), jnp.float32),
        grid_spec=pltpu.PrefetchScalarGridSpec(
            num_scalar_prefetch=0,
            grid=(T,),
            in_specs=[
                pl.BlockSpec((pl.Squeezed(), N, F_in), lambda t: (t, 0, 0)),
                pl.BlockSpec((pl.Squeezed(), N, N), lambda t: (t, 0, 0)),
                pl.BlockSpec((F_in, 4 * F_out), lambda t: (0, 0)),
                pl.BlockSpec((K, F_out, 4 * F_out), lambda t: (0, 0, 0)),
                pl.BlockSpec((1, 4 * F_out), lambda t: (0, 0)),
            ],
            out_specs=pl.BlockSpec((N, F_out), lambda t: (0, 0)),
            scratch_shapes=[
                pltpu.VMEM((N, F_out), jnp.float32),   # H
                pltpu.VMEM((N, F_out), jnp.float32),   # C
            ],
        ),
        compiler_params=pltpu.CompilerParams(
            dimension_semantics=("arbitrary",)),       # time is sequential
    )(x_seq, s_seq, wx_big, wc_big, b_big)


# ----------------------------------------------------------------------------
# Glue: densify the graph (edge_index, edge_feats) into the scaled Laplacian.
# ----------------------------------------------------------------------------
def build_scaled_laplacian(edge_index, edge_weight, num_nodes):
    src, dst = edge_index[0], edge_index[1]
    A = jnp.zeros((num_nodes, num_nodes), jnp.float32).at[dst, src].add(
        edge_weight)
    deg = jnp.zeros((num_nodes,), jnp.float32).at[src].add(edge_weight)
    dinv = jnp.where(deg > 0, 1.0 / jnp.sqrt(deg), 0.0)
    # lambda_max = 2, sym norm  =>  S_hat = -D^{-1/2} A D^{-1/2}
    return -(dinv[:, None] * A * dinv[None, :])


# Pure-JAX reference of the GCLSTM2 forward (for correctness check).
def ref_forward(x_seq, s_seq, wx, wc, b, K):
    T, N, _ = x_seq.shape
    F_out = wx.shape[-1]
    H = jnp.zeros((N, F_out), jnp.float32)
    C = jnp.zeros((N, F_out), jnp.float32)
    for t in range(T):
        X, S = x_seq[t], s_seq[t]

        def gate(g, H=H, X=X, S=S):
            out = X @ wx[g] + H @ wc[g, 0]
            if K > 1:
                T1 = S @ H
                out = out + T1 @ wc[g, 1]
                Tm2, Tm1 = H, T1
                for k in range(2, K):
                    T2 = 2.0 * (S @ Tm1) - Tm2
                    out = out + T2 @ wc[g, k]
                    Tm2, Tm1 = Tm1, T2
            return out + b[g]

        i = jax.nn.sigmoid(gate(0))
        f = jax.nn.sigmoid(gate(1))
        C = f * C + i * jnp.tanh(gate(2))
        o = jax.nn.sigmoid(gate(3))
        H = o * jnp.tanh(C)
    return jnp.maximum(H, 0.0)


if __name__ == "__main__":
    # Small, deterministic synthetic problem.
    T = 6          # number of temporal graph snapshots
    N = 16         # nodes
    F_IN = 8       # args.feats_per_node
    F_OUT = 32     # args.layer_2_feats  (4*F_OUT = 128 -> lane-dense gates)
    K = 3          # args.K (Chebyshev order)

    key = jax.random.PRNGKey(0)

    node_feats_list, s_list = [], []
    for _ in range(T):
        key, k_adj, k_w, k_x = jax.random.split(key, 4)
        mask = jax.random.bernoulli(k_adj, 0.3, (N, N))
        mask = jnp.logical_or(mask, mask.T) & ~jnp.eye(N, dtype=bool)
        w = jax.random.uniform(k_w, (N, N), jnp.float32, 0.5, 1.5)
        w = 0.5 * (w + w.T)
        src, dst = jnp.nonzero(mask)                       # edge_index_list[t]
        edge_index = jnp.stack([src, dst]).astype(jnp.int32)
        edge_feats = w[src, dst]                           # edge_feats_list[t]
        s_list.append(build_scaled_laplacian(edge_index, edge_feats, N))
        node_feats_list.append(
            jax.random.normal(k_x, (N, F_IN), jnp.float32))
    # TODO(synk): nodes_mask_list is accepted by the PyTorch module but never
    # used in its forward, so it is intentionally omitted here.

    x_seq = jnp.stack(node_feats_list)      # (T, N, F_in)
    s_seq = jnp.stack(s_list)               # (T, N, N)

    def glorot(k, shape):
        fan_in, fan_out = shape[-2], shape[-1]
        lim = (6.0 / (fan_in + fan_out)) ** 0.5
        return jax.random.uniform(k, shape, jnp.float32, -lim, lim)

    key, k1, k2, k3 = jax.random.split(key, 4)
    wx = glorot(k1, (4, F_IN, F_OUT))                 # W_i, W_f, W_c, W_o
    wc = glorot(k2, (4, K, F_OUT, F_OUT))             # ChebConv Theta per gate
    # gate biases (1,F_out) + ChebConv biases (F_out,), folded into one add
    b = 0.05 * jax.random.normal(k3, (4, F_OUT), jnp.float32)

    out = gclstm2_forward(x_seq, s_seq, wx, wc, b, K=K)
    out = jax.block_until_ready(out)

    ref = ref_forward(x_seq, s_seq, wx, wc, b, K)
    assert out.shape == (N, F_OUT)
    assert jnp.allclose(out, ref, atol=2e-5, rtol=1e-5), "mismatch vs reference"

    print("KERNEL_OK")
</pallas_src>

<mosaic_0001>
module attributes {stable_mosaic.version = 11 : i64} {
  func.func @gclstm_kernel(%arg0: i32, %arg1: memref<1x16x8xf32, #tpu.memory_space<vmem>>, %arg2: memref<1x16x16xf32, #tpu.memory_space<vmem>>, %arg3: memref<8x128xf32, #tpu.memory_space<vmem>>, %arg4: memref<3x32x128xf32, #tpu.memory_space<vmem>>, %arg5: memref<1x128xf32, #tpu.memory_space<vmem>>, %arg6: memref<16x32xf32, #tpu.memory_space<vmem>>, %arg7: memref<16x32xf32, #tpu.memory_space<vmem>>, %arg8: memref<16x32xf32, #tpu.memory_space<vmem>>) attributes {dimension_semantics = [#tpu.dimension_semantics<arbitrary>], iteration_bounds = array<i64: 6>, scalar_prefetch = 0 : i64, scratch_operands = 2 : i64, tpu.core_type = #tpu.core_type<tc>, window_params = [{transform_indices = @transform_0, window_bounds = array<i64: 1, 16, 8>}, {transform_indices = @transform_1, window_bounds = array<i64: 1, 16, 16>}, {pipeline_mode = #tpu.pipeline_mode<synchronous>, transform_indices = @transform_2, window_bounds = array<i64: 8, 128>}, {pipeline_mode = #tpu.pipeline_mode<synchronous>, transform_indices = @transform_3, window_bounds = array<i64: 3, 32, 128>}, {pipeline_mode = #tpu.pipeline_mode<synchronous>, transform_indices = @transform_4, window_bounds = array<i64: 1, 128>}, {pipeline_mode = #tpu.pipeline_mode<synchronous>, transform_indices = @transform_5, window_bounds = array<i64: 16, 32>}]} {
    %c0_i32 = arith.constant 0 : i32
    %0 = arith.cmpi eq, %arg0, %c0_i32 : i32
    %1 = arith.extui %0 : i1 to i32
    %c0_i32_0 = arith.constant 0 : i32
    %2 = arith.cmpi ne, %1, %c0_i32_0 : i32
    scf.if %2 {
      %cst_37 = arith.constant 0.000000e+00 : f32
      %61 = vector.broadcast %cst_37 : f32 to vector<16x32xf32>
      %c0_38 = arith.constant 0 : index
      %c0_39 = arith.constant 0 : index
      %62 = vector.load %arg7[%c0_38, %c0_39] : memref<16x32xf32, #tpu.memory_space<vmem>>, vector<16x32xf32>
      tpu.vector_store %arg7[%c0_38, %c0_39], %61 {strides = array<i32>} : memref<16x32xf32, #tpu.memory_space<vmem>>, vector<16x32xf32>,
      %cst_40 = arith.constant 0.000000e+00 : f32
      %63 = vector.broadcast %cst_40 : f32 to vector<16x32xf32>
      %c0_41 = arith.constant 0 : index
      %c0_42 = arith.constant 0 : index
      %64 = vector.load %arg8[%c0_41, %c0_42] : memref<16x32xf32, #tpu.memory_space<vmem>>, vector<16x32xf32>
      tpu.vector_store %arg8[%c0_41, %c0_42], %63 {strides = array<i32>} : memref<16x32xf32, #tpu.memory_space<vmem>>, vector<16x32xf32>,
    } else {
    }
    %c0 = arith.constant 0 : index
    %c0_1 = arith.constant 0 : index
    %c0_2 = arith.constant 0 : index
    %3 = vector.load %arg1[%c0, %c0_1, %c0_2] : memref<1x16x8xf32, #tpu.memory_space<vmem>>, vector<1x16x8xf32>
    %4 = vector.shape_cast %3 : vector<1x16x8xf32> to vector<16x8xf32>
    %c0_3 = arith.constant 0 : index
    %c0_4 = arith.constant 0 : index
    %c0_5 = arith.constant 0 : index
    %5 = vector.load %arg2[%c0_3, %c0_4, %c0_5] : memref<1x16x16xf32, #tpu.memory_space<vmem>>, vector<1x16x16xf32>
    %6 = vector.shape_cast %5 : vector<1x16x16xf32> to vector<16x16xf32>
    %c0_6 = arith.constant 0 : index
    %c0_7 = arith.constant 0 : index
    %7 = vector.load %arg7[%c0_6, %c0_7] : memref<16x32xf32, #tpu.memory_space<vmem>>, vector<16x32xf32>
    %c0_8 = arith.constant 0 : index
    %c0_9 = arith.constant 0 : index
    %8 = vector.load %arg8[%c0_8, %c0_9] : memref<16x32xf32, #tpu.memory_space<vmem>>, vector<16x32xf32>
    %c0_10 = arith.constant 0 : index
    %c0_11 = arith.constant 0 : index
    %9 = vector.load %arg3[%c0_10, %c0_11] : memref<8x128xf32, #tpu.memory_space<vmem>>, vector<8x128xf32>
    %cst = arith.constant dense<0.000000e+00> : vector<16x128xf32>
    %10 = tpu.matmul %4, %9, %cst {dimension_numbers = #tpu.dot_dimension_numbers<[1], [0], [0], [1], [0, 0, 1, 1], [], []>} : vector<16x8xf32>, vector<8x128xf32>, vector<16x128xf32> -> vector<16x128xf32>
    %c0_12 = arith.constant 0 : index
    %c0_13 = arith.constant 0 : index
    %c0_14 = arith.constant 0 : index
    %11 = vector.load %arg4[%c0_12, %c0_13, %c0_14] : memref<3x32x128xf32, #tpu.memory_space<vmem>>, vector<1x32x128xf32>
    %12 = vector.shape_cast %11 : vector<1x32x128xf32> to vector<32x128xf32>
    %cst_15 = arith.constant dense<0.000000e+00> : vector<16x128xf32>
    %13 = tpu.matmul %7, %12, %cst_15 {dimension_numbers = #tpu.dot_dimension_numbers<[1], [0], [0], [1], [0, 0, 1, 1], [], []>} : vector<16x32xf32>, vector<32x128xf32>, vector<16x128xf32> -> vector<16x128xf32>
    %14 = arith.addf %10, %13 : vector<16x128xf32>
    %cst_16 = arith.constant dense<0.000000e+00> : vector<16x32xf32>
    %15 = tpu.matmul %6, %7, %cst_16 {dimension_numbers = #tpu.dot_dimension_numbers<[1], [0], [0], [1], [0, 0, 1, 1], [], []>} : vector<16x16xf32>, vector<16x32xf32>, vector<16x32xf32> -> vector<16x32xf32>
    %c1 = arith.constant 1 : index
    %c0_17 = arith.constant 0 : index
    %c0_18 = arith.constant 0 : index
    %16 = vector.load %arg4[%c1, %c0_17, %c0_18] : memref<3x32x128xf32, #tpu.memory_space<vmem>>, vector<1x32x128xf32>
    %17 = vector.shape_cast %16 : vector<1x32x128xf32> to vector<32x128xf32>
    %cst_19 = arith.constant dense<0.000000e+00> : vector<16x128xf32>
    %18 = tpu.matmul %15, %17, %cst_19 {dimension_numbers = #tpu.dot_dimension_numbers<[1], [0], [0], [1], [0, 0, 1, 1], [], []>} : vector<16x32xf32>, vector<32x128xf32>, vector<16x128xf32> -> vector<16x128xf32>
    %19 = arith.addf %14, %18 : vector<16x128xf32>
    %cst_20 = arith.constant dense<0.000000e+00> : vector<16x32xf32>
    %20 = tpu.matmul %6, %15, %cst_20 {dimension_numbers = #tpu.dot_dimension_numbers<[1], [0], [0], [1], [0, 0, 1, 1], [], []>} : vector<16x16xf32>, vector<16x32xf32>, vector<16x32xf32> -> vector<16x32xf32>
    %cst_21 = arith.constant 2.000000e+00 : f32
    %21 = vector.broadcast %cst_21 : f32 to vector<16x32xf32>
    %22 = arith.mulf %21, %20 : vector<16x32xf32>
    %23 = arith.subf %22, %7 : vector<16x32xf32>
    %c2 = arith.constant 2 : index
    %c0_22 = arith.constant 0 : index
    %c0_23 = arith.constant 0 : index
    %24 = vector.load %arg4[%c2, %c0_22, %c0_23] : memref<3x32x128xf32, #tpu.memory_space<vmem>>, vector<1x32x128xf32>
    %25 = vector.shape_cast %24 : vector<1x32x128xf32> to vector<32x128xf32>
    %cst_24 = arith.constant dense<0.000000e+00> : vector<16x128xf32>
    %26 = tpu.matmul %23, %25, %cst_24 {dimension_numbers = #tpu.dot_dimension_numbers<[1], [0], [0], [1], [0, 0, 1, 1], [], []>} : vector<16x32xf32>, vector<32x128xf32>, vector<16x128xf32> -> vector<16x128xf32>
    %27 = arith.addf %19, %26 : vector<16x128xf32>
    %c0_25 = arith.constant 0 : index
    %c0_26 = arith.constant 0 : index
    %28 = vector.load %arg5[%c0_25, %c0_26] : memref<1x128xf32, #tpu.memory_space<vmem>>, vector<1x128xf32>
    %29 = vector.broadcast %28 : vector<1x128xf32> to vector<16x128xf32>
    %30 = arith.addf %27, %29 : vector<16x128xf32>
    %31 = vector.extract_strided_slice %30 {offsets = [0, 0], sizes = [16, 32], strides = [1, 1]} : vector<16x128xf32> to vector<16x32xf32>
    %32 = arith.negf %31 : vector<16x32xf32>
    %33 = math.exp %32 : vector<16x32xf32>
    %cst_27 = arith.constant 1.000000e+00 : f32
    %34 = vector.broadcast %cst_27 : f32 to vector<16x32xf32>
    %35 = arith.addf %34, %33 : vector<16x32xf32>
    %36 = arith.divf %34, %35 : vector<16x32xf32>
    %37 = vector.extract_strided_slice %30 {offsets = [0, 32], sizes = [16, 32], strides = [1, 1]} : vector<16x128xf32> to vector<16x32xf32>
    %38 = arith.negf %37 : vector<16x32xf32>
    %39 = math.exp %38 : vector<16x32xf32>
    %cst_28 = arith.constant 1.000000e+00 : f32
    %40 = vector.broadcast %cst_28 : f32 to vector<16x32xf32>
    %41 = arith.addf %40, %39 : vector<16x32xf32>
    %42 = arith.divf %40, %41 : vector<16x32xf32>
    %43 = vector.extract_strided_slice %30 {offsets = [0, 64], sizes = [16, 32], strides = [1, 1]} : vector<16x128xf32> to vector<16x32xf32>
    %44 = math.tanh %43 : vector<16x32xf32>
    %45 = vector.extract_strided_slice %30 {offsets = [0, 96], sizes = [16, 32], strides = [1, 1]} : vector<16x128xf32> to vector<16x32xf32>
    %46 = arith.negf %45 : vector<16x32xf32>
    %47 = math.exp %46 : vector<16x32xf32>
    %cst_29 = arith.constant 1.000000e+00 : f32
    %48 = vector.broadcast %cst_29 : f32 to vector<16x32xf32>
    %49 = arith.addf %48, %47 : vector<16x32xf32>
    %50 = arith.divf %48, %49 : vector<16x32xf32>
    %51 = arith.mulf %42, %8 : vector<16x32xf32>
    %52 = arith.mulf %36, %44 : vector<16x32xf32>
    %53 = arith.addf %51, %52 : vector<16x32xf32>
    %54 = math.tanh %53 : vector<16x32xf32>
    %55 = arith.mulf %50, %54 : vector<16x32xf32>
    %c0_30 = arith.constant 0 : index
    %c0_31 = arith.constant 0 : index
    %56 = vector.load %arg7[%c0_30, %c0_31] : memref<16x32xf32, #tpu.memory_space<vmem>>, vector<16x32xf32>
    tpu.vector_store %arg7[%c0_30, %c0_31], %55 {strides = array<i32>} : memref<16x32xf32, #tpu.memory_space<vmem>>, vector<16x32xf32>,
    %c0_32 = arith.constant 0 : index
    %c0_33 = arith.constant 0 : index
    %57 = vector.load %arg8[%c0_32, %c0_33] : memref<16x32xf32, #tpu.memory_space<vmem>>, vector<16x32xf32>
    tpu.vector_store %arg8[%c0_32, %c0_33], %53 {strides = array<i32>} : memref<16x32xf32, #tpu.memory_space<vmem>>, vector<16x32xf32>,
    %cst_34 = arith.constant 0.000000e+00 : f32
    %58 = vector.broadcast %cst_34 : f32 to vector<16x32xf32>
    %59 = arith.maximumf %55, %58 : vector<16x32xf32>
    %c0_35 = arith.constant 0 : index
    %c0_36 = arith.constant 0 : index
    %60 = vector.load %arg6[%c0_35, %c0_36] : memref<16x32xf32, #tpu.memory_space<vmem>>, vector<16x32xf32>
    tpu.vector_store %arg6[%c0_35, %c0_36], %59 {strides = array<i32>} : memref<16x32xf32, #tpu.memory_space<vmem>>, vector<16x32xf32>,
    return
  }
  func.func @transform_0(%arg0: i32) -> (i32, i32, i32) {
    %c0_i32 = arith.constant 0 : i32
    %c0_i32_0 = arith.constant 0 : i32
    %c0_i32_1 = arith.constant 0 : i32
    return %arg0, %c0_i32, %c0_i32_0 : i32, i32, i32
  }
  func.func @transform_1(%arg0: i32) -> (i32, i32, i32) {
    %c0_i32 = arith.constant 0 : i32
    %c0_i32_0 = arith.constant 0 : i32
    %c0_i32_1 = arith.constant 0 : i32
    return %arg0, %c0_i32, %c0_i32_0 : i32, i32, i32
  }
  func.func @transform_2(%arg0: i32) -> (i32, i32) {
    %c0_i32 = arith.constant 0 : i32
    %c0_i32_0 = arith.constant 0 : i32
    %c0_i32_1 = arith.constant 0 : i32
    return %c0_i32, %c0_i32_0 : i32, i32
  }
  func.func @transform_3(%arg0: i32) -> (i32, i32, i32) {
    %c0_i32 = arith.constant 0 : i32
    %c0_i32_0 = arith.constant 0 : i32
    %c0_i32_1 = arith.constant 0 : i32
    %c0_i32_2 = arith.constant 0 : i32
    return %c0_i32, %c0_i32_0, %c0_i32_1 : i32, i32, i32
  }
  func.func @transform_4(%arg0: i32) -> (i32, i32) {
    %c0_i32 = arith.constant 0 : i32
    %c0_i32_0 = arith.constant 0 : i32
    %c0_i32_1 = arith.constant 0 : i32
    return %c0_i32, %c0_i32_0 : i32, i32
  }
  func.func @transform_5(%arg0: i32) -> (i32, i32) {
    %c0_i32 = arith.constant 0 : i32
    %c0_i32_0 = arith.constant 0 : i32
    %c0_i32_1 = arith.constant 0 : i32
    return %c0_i32, %c0_i32_0 : i32, i32
  }
}

</mosaic_0001>

<bundles_post_ra>
// kernel: tpu_custom_call.1
= control target key start
LH: loop header
LB: loop body
LE: loop exit
PB: predicated region body
PF: predicated region fallthrough
CT: control target
= control target key end

     0   :  { %10 = vsyncpa [#allocation5], 0  ;;  %s922_s0 = inlined_call_operand.vmem [shape: f32[6,16,8], index: 0, kind: input, shape index: {}]   ;;  %s923_s1 = inlined_call_operand.vmem [shape: f32[6,16,16], index: 1, kind: input, shape index: {}]   ;;  %s924_s2 = inlined_call_operand.vmem [shape: f32[8,128], index: 2, kind: input, shape index: {}]   ;;  %s925_s3 = inlined_call_operand.hbm [shape: f32[3,32,128], index: 3, kind: input, shape index: {}]   ;;  %s926_s4 = inlined_call_operand.vmem [shape: f32[1,128], index: 4, kind: input, shape index: {}]   ;;  %s927_s5 = inlined_call_operand.hbm [shape: f32[16,32], index: 5, kind: output, shape index: {}]  }
   0x1   :  { %11 = vsyncpa [#allocation6], 0  ;;  %s852_s18 = smov 0  }
   0x2 LB: > { %s172_s21 = sshll.u32 %s925_s3, 4  ;;  %s861_s22 = sadd.s32 4294967295, %s810_s18   ;;  %s810_s18 = sphi %s852_s18, %s17_s18   ;;  %s173_s21 = int_to_ptr.hbm [resolvable:$true] %s172_s21 }
   0x3   : > { %p654_p0 = scmp.ge.s32.totalorder %s810_s18, 1  ;;  %p158_p1 = scmp.lt.s32.totalorder %s810_s18, 7 }
   0x4   : > { %p655_p2 = scmp.ne.s32.totalorder %s861_s22, 0  ;;  %p699_p3 = scmp.eq.s32.totalorder %s861_s22, 0 }
   0x5   : > { %p159_p4 = pnand %p654_p0, %p158_p1  ;;  %s812_s23 = smov [#allocation4]  }
   0x6   : > { %s174_s24 = sshll.u32 %s812_s23, 4  ;;  %s813_s25 = smov 128   ;;  %s175_s24 = int_to_ptr.vmem [resolvable:$true] %s174_s24 }
   0x7   : > { %p695_p5 = pneg %p159_p4  ;;  %s814_s26 = smov 8  }
   0x8   : > { %209 = sbr.rel (%p159_p4) target bundleno = 919 (0x397), region = 40 }
   0x9   : > { %p696_p6 = pnand %p699_p3, %p695_p5 }
   0xb   : > { %698 = dma.hbm_to_vmem [thread:$0]  (!%p696_p6), %s173_s21, 1536, %s175_s24, [#allocation5], %s813_s25, %s813_s25, %s814_s26  }
   0xd   : > { %801 = dma.done.wait (%p699_p3), [#allocation5], 1536  }
   0xe   : > { %803 = vsyncadd (%p699_p3), [#allocation5], 4294965760  ;;  %p238_p7 = scmp.lt.s32.totalorder %s861_s22, 5 }
   0xf   : > { %251 = sbr.rel (%p655_p2) target bundleno = 25 (0x19), region = 48 }
  0x10   : > { %s239_s27 = scalar_select %p238_p7, %s861_s22, 5 }
  0x12   : > { %s682_s28 = sshll.u32 %s239_s27, 4 }
  0x13   : > { %s242_s6 = scalar_lea.vmem %s922_s0, %s682_s28  ;;  %s875_s9 = scalar_lea.vmem %s923_s1, %s682_s28 }
  0x14   : > { %vm252_vm0 = vcmask 261120   ;;  %v815_v0 = vmov 0.0  }
  0x15   : > { %253 = vst.msk [vmem:[#allocation2] sm:$0xff] %vm252_vm0, %v815_v0 }
  0x16   : > { %254 = vst.msk [vmem:[#allocation2 + $0x8] sm:$0xff] %vm252_vm0, %v815_v0 }
  0x17   : > { %255 = vst.msk [vmem:[#allocation3] sm:$0xff] %vm252_vm0, %v815_v0 }
  0x18   : > { %256 = vst.msk [vmem:[#allocation3 + $0x8] sm:$0xff] %vm252_vm0, %v815_v0 }
  0x19 PF: > { %v269_v1 = vld [vmem:[#allocation4 + $0x18] sm:$0xff]  ;;  %v268_v2 = vld [vmem:[#allocation4 + $0x10] sm:$0xff]  ;;  %vm300_vm1 = vcmask 64512   ;;  %v267_v3 = vld [vmem:[#allocation4 + $0x8] sm:$0xff]  ;;  %vm330_vm2 = vcmask 130048   ;;  %vm270_vm3 = vcmask 261120  }
  0x1a   : > { %289 = vmatpush.msra.mxu0 %v269_v1  ;;  %v265_v4 = vld [vmem:[%s924_s2] sm:$0xff]  ;;  %v258_v6 = vld [vmem:[%s242_s6 + $0x8] sm:$0xff]  ;;  %v364_v12 = vld [vmem:[#allocation4 + $0x38] sm:$0xff]  ;;  %s816_s12 = smov 32   ;;  %s817_s15 = smov 64  }
  0x1b   : > { %322 = vmatpush.msra.mxu1 %v265_v4  ;;  %v257_v5 = vld [vmem:[%s242_s6] sm:$0xff]  ;;  %684 = vmatpush.msra.mxu3 %v265_v4  ;;  %v260_v9 = vld [vmem:[%s875_s9 + $0x8] sm:$0xff]  ;;  %v363_v13 = vld [vmem:[#allocation4 + $0x30] sm:$0xff]  ;;  %s818_s16 = smov 96   ;;  %s819_s17 = smov [#allocation7]  }
  0x1c   : > { %290 = vmatpush.msra.mxu0 %v268_v2  ;;  %666 = vmatmul.msk.f32.vlgmr.msra.gmra.mxu1 %vm300_vm1, %v257_v5  ;;  %v266_v8 = vld [vmem:[#allocation4] sm:$0xff]  ;;  %v362_v14 = vld [vmem:[#allocation4 + $0x28] sm:$0xff]  ;;  %v427_v16 = vld [vmem:[#allocation4 + $0x58] sm:$0xff]  ;;  %s584_s19 = sshll.u32 %s819_s17, 4  ;;  %s586_s23 = sshll.u32 %s927_s5, 4  ;;  %s585_s19 = int_to_ptr.vmem [resolvable:$true] %s584_s19  ;;  %s587_s23 = int_to_ptr.hbm [resolvable:$true] %s586_s23 }
  0x1d   : > { %v262_v7 = vld [vmem:[#allocation2 + $0x8] sm:$0xff]  ;;  %667 = vmatmul.msk.f32.vlgmr.msra.gmra.mxu3 %vm300_vm1, %v258_v6  ;;  %v261_v10 = vld [vmem:[#allocation2] sm:$0xff]  ;;  %v426_v21 = vld [vmem:[#allocation4 + $0x50] sm:$0xff]  ;;  %p701_p8 = scmp.eq.s32.totalorder %s861_s22, 5  ;;  %s820_s24 = smov 128  }
  0x1e   : > { %685 = vmatpush.msra.mxu2 %v262_v7  ;;  %291 = vmatpush.msra.mxu0 %v267_v3  ;;  %v259_v11 = vld [vmem:[%s875_s9] sm:$0xff]  ;;  %v425_v22 = vld [vmem:[#allocation4 + $0x48] sm:$0xff]  ;;  %v263_v24 = vld [vmem:[#allocation3] sm:$0xff]  ;;  %s821_s25 = smov 8  }
  0x1f   : > { %383 = vmatpush.msrb.mxu3 %v364_v12  ;;  %v361_v15 = vld [vmem:[#allocation4 + $0x20] sm:$0xff]  ;;  %507 = vrot.lane.b32.xlu1 %v263_v24, %s816_s12  ;;  %v264_v25 = vld [vmem:[#allocation3 + $0x8] sm:$0xff] }
  0x20   : > { %686 = vmatpush.msra.mxu2 %v261_v10  ;;  %292 = vmatpush.msra.mxu0 %v266_v8  ;;  %v424_v23 = vld [vmem:[#allocation4 + $0x40] sm:$0xff] }
  0x21   : > { %669 = vmatmul.msk.f32.vlgmr.msra.gmra.mxu2 %vm330_vm2, %v260_v9  ;;  %664 = vmatmul.msk.f32.vlgmr.msra.gmra.mxu0 %vm270_vm3, %v261_v10  ;;  %v721_v37 = vld [vmem:[%s926_s4] ss:$0 sm:$0xff] }
  0x22   : > { %351 = vmatpush.msrb.mxu0 %v262_v7  ;;  %384 = vmatpush.msrb.mxu3 %v363_v13 }
  0x23   : > { %446 = vmatpush.msrb.mxu2 %v427_v16 }
  0x24   : > { %352 = vmatpush.msrb.mxu0 %v261_v10  ;;  %385 = vmatpush.msrb.mxu3 %v362_v14 }
  0x25   : > { %447 = vmatpush.msrb.mxu2 %v426_v21 }
  0x26   : > { %386 = vmatpush.msrb.mxu3 %v361_v15 }
  0x27   : > { %448 = vmatpush.msrb.mxu2 %v425_v22  ;;  %509 = vrot.lane.b32.xlu1 %v264_v25, %s816_s12 }
  0x29   : > { %665 = vmatmul.msk.f32.gmra.mxu0 %vm270_vm3, %v262_v7  ;;  %449 = vmatpush.msrb.mxu2 %v424_v23 }
  0x31   : > { %668 = vmatmul.msk.f32.vlgmr.msrb.gmra.mxu0 %vm330_vm2, %v259_v11 }
  0x91   : > { %v508_v15 = vpop.permute.xlu1 %507 }
  0x99   : > { %v324_v26 = vpop.f32.mrf.mxu1 }
  0x9e   : > { %v294_v17 = vpop.f32.mrf.mxu0 }
  0x9f   : > { %v325_v35 = vadd.f32 %v324_v26, %v294_v17 }
  0xa0   : > { %v327_v33 = vpop.f32.mrf.mxu3 }
  0xa4   : > { %v357_v18 = vpop.f32.mrf.mxu2 }
  0xa5   : > { %410 = vmatpush.msrb.mxu1 %v357_v18 }
  0xa6   : > { %v297_v19 = vpop.f32.mrf.mxu0 }
  0xa7   : > { %v328_v42 = vadd.f32 %v327_v33, %v297_v19  ;;  %v510_v19 = vpop.permute.xlu1 %509 }
  0xae   : > { %v354_v20 = vpop.f32.mrf.mxu0 }
  0xaf   : > { %670 = vmatmul.msk.f32.vlgmr.msrb.gmra.mxu3 %vm270_vm3, %v354_v20  ;;  %411 = vmatpush.msrb.mxu1 %v354_v20 }
  0xb0   : > { %672 = vmatmul.msk.f32.vlgmr.msrb.gmra.mxu1 %vm330_vm2, %v259_v11 }
  0xb7   : > { %671 = vmatmul.msk.f32.gmra.mxu3 %vm270_vm3, %v357_v18 }
  0xb8   : > { %673 = vmatmul.msk.f32.gmra.mxu1 %vm330_vm2, %v260_v9 }
 0x12d   : > { %v413_v27 = vpop.f32.mrf.mxu1 }
 0x12e   : > { %v419_v28 = vmul.f32 2.0, %v413_v27 }
 0x130   : > { %v421_v29 = vsub.f32 %v419_v28, %v261_v10 }
 0x132   : > { %674 = vmatmul.msk.f32.vlgmr.msrb.gmra.mxu2 %vm270_vm3, %v421_v29  ;;  %v388_v34 = vpop.f32.mrf.mxu3 }
 0x133   : > { %v394_v36 = vadd.f32 %v388_v34, %v325_v35 }
 0x135   : > { %v416_v30 = vpop.f32.mrf.mxu1 }
 0x136   : > { %v420_v31 = vmul.f32 2.0, %v416_v30 }
 0x138   : > { %v422_v32 = vsub.f32 %v420_v31, %v262_v7 }
 0x13a   : > { %675 = vmatmul.msk.f32.gmra.mxu2 %vm270_vm3, %v422_v32  ;;  %v391_v41 = vpop.f32.mrf.mxu3 }
 0x13b   : > { %v395_v43 = vadd.f32 %v391_v41, %v328_v42 }
 0x1b5   : > { %v451_v38 = vpop.f32.mrf.mxu2 }
 0x1b6   : > { %v457_v39 = vadd.f32 %v451_v38, %v394_v36 }
 0x1b8   : > { %v463_v40 = vadd.f32 %v721_v37, %v457_v39 }
 0x1ba   : > { %722 = vtanh.f32 %v463_v40  ;;  %v676_v49 = vmul.f32 -1.442695, %v463_v40 }
 0x1bd   : > { %v454_v44 = vpop.f32.mrf.mxu2 }
 0x1be   : > { %v458_v45 = vadd.f32 %v454_v44, %v395_v43 }
 0x1c0   : > { %v723_v46 = vpop.eup %722  ;;  %v464_v47 = vadd.f32 %v721_v37, %v458_v45 }
 0x1c1   : > { %517 = vrot.lane.b32.xlu0 %v723_v46, %s817_s15 }
 0x1c2   : > { %724 = vtanh.f32 %v464_v47  ;;  %v677_v50 = vmul.f32 -1.442695, %v464_v47 }
 0x1c3   : > { %726 = vpow2.f32 %v676_v49 }
 0x1c4   : > { %728 = vpow2.f32 %v677_v50 }
 0x1c8   : > { %v725_v48 = vpop.eup %724 }
 0x1c9   : > { %519 = vrot.lane.b32.xlu0 %v725_v48, %s817_s15  ;;  %v727_v51 = vpop.eup %726 }
 0x1ca   : > { %v471_v52 = vadd.f32 1.0, %v727_v51  ;;  %v729_v53 = vpop.eup %728 }
 0x1cb   : > { %v472_v54 = vadd.f32 1.0, %v729_v53 }
 0x1cc   : > { %730 = vrcp.f32 %v471_v52  ;;  %v484_v63 = vand.u32 2147483648, %v471_v52  ;;  %vm478_vm5 = vweird.f32 %v471_v52  ;;  %v482_v0 = vand.u32 2147483647, %v471_v52 }
 0x1cd   : > { %732 = vrcp.f32 %v472_v54  ;;  %v499_v8 = vand.u32 2147483648, %v472_v54  ;;  %vm493_vm9 = vweird.f32 %v472_v54  ;;  %v497_v9 = vand.u32 2147483647, %v472_v54 }
 0x1ce   : > { %v485_v3 = vor.u32 1.1754944e-38, %v484_v63  ;;  %vm483_vm7 = vcmp.eq.f32.partialorder %v482_v0, 8.507059e+37 }
 0x1cf   : > { %v500_v11 = vor.u32 1.1754944e-38, %v499_v8  ;;  %vm498_vm11 = vcmp.eq.f32.partialorder %v497_v9, 8.507059e+37 }
 0x1d2   : > { %v731_v55 = vpop.eup %730 }
 0x1d3   : > { %v474_v56 = vmul.f32 %v731_v55, %v471_v52  ;;  %v733_v58 = vpop.eup %732  ;;  %vm479_vm4 = vweird.f32 %v731_v55 }
 0x1d4   : > { %v489_v60 = vmul.f32 %v733_v58, %v472_v54  ;;  %vm480_vm6 = vmor %vm478_vm5, %vm479_vm4  ;;  %vm494_vm8 = vweird.f32 %v733_v58 }
 0x1d5   : > { %v475_v57 = vsub.f32 1.0, %v474_v56  ;;  %vm495_vm10 = vmor %vm493_vm9, %vm494_vm8 }
 0x1d6   : > { %v490_v62 = vsub.f32 1.0, %v489_v60 }
 0x1d7   : > { %v476_v59 = vmul.f32 %v731_v55, %v475_v57 }
 0x1d8   : > { %v491_v2 = vmul.f32 %v733_v58, %v490_v62 }
 0x1d9   : > { %v477_v61 = vadd.f32 %v731_v55, %v476_v59 }
 0x1da   : > { %v492_v6 = vadd.f32 %v733_v58, %v491_v2 }
 0x1db   : > { %v481_v1 = vsel %vm480_vm6, %v731_v55, %v477_v61 }
 0x1dc   : > { %v486_v4 = vsel %vm483_vm7, %v485_v3, %v481_v1  ;;  %v496_v10 = vsel %vm495_vm10, %v733_v58, %v492_v6 }
 0x1dd   : > { %v501_v12 = vsel %vm498_vm11, %v500_v11, %v496_v10  ;;  %v513_v16 = vmul.f32 %v508_v15, %v486_v4 }
 0x1de   : > { %v514_v20 = vmul.f32 %v510_v19, %v501_v12 }
 0x233   : > { %v518_v5 = vpop.permute.xlu0 %517 }
 0x234   : > { %v523_v7 = vmul.f32 %v518_v5, %v486_v4 }
 0x236   : > { %527 = vrot.lane.b32.xlu2 %v523_v7, %s816_s12 }
 0x23b   : > { %v520_v13 = vpop.permute.xlu0 %519 }
 0x23c   : > { %v524_v14 = vmul.f32 %v520_v13, %v501_v12 }
 0x23e   : > { %529 = vrot.lane.b32.xlu2 %v524_v14, %s816_s12 }
 0x290   : > { %v528_v17 = vpop.permute.xlu2 %527 }
 0x291   : > { %v533_v18 = vadd.f32 %v528_v17, %v513_v16 }
 0x293   : > { %734 = vtanh.f32 %v533_v18 }
 0x298   : > { %v530_v21 = vpop.permute.xlu2 %529 }
 0x299   : > { %v735_v22 = vpop.eup %734  ;;  %v534_v23 = vadd.f32 %v530_v21, %v514_v20 }
 0x29a   : > { %539 = vrot.lane.b32.xlu0 %v735_v22, %s817_s15 }
 0x29b   : > { %736 = vtanh.f32 %v534_v23 }
 0x2a1   : > { %v737_v24 = vpop.eup %736 }
 0x2a2   : > { %541 = vrot.lane.b32.xlu1 %v737_v24, %s817_s15 }
 0x30c   : > { %v540_v25 = vpop.permute.xlu0 %539 }
 0x30d   : > { %v545_v26 = vmul.f32 %v540_v25, %v486_v4 }
 0x30f   : > { %v567_v27 = vmax.f32 %v545_v26, 0.0  ;;  %549 = vrot.lane.b32.xlu1 %v545_v26, %s816_s12 }
 0x311   : > { %571 = vrot.lane.b32.xlu2 %v567_v27, %s816_s12 }
 0x314   : > { %v542_v28 = vpop.permute.xlu1 %541 }
 0x315   : > { %v546_v29 = vmul.f32 %v542_v28, %v501_v12 }
 0x317   : > { %v568_v30 = vmax.f32 %v546_v29, 0.0  ;;  %561 = vrot.lane.b32.xlu1 %v534_v23, %s818_s16 }
 0x319   : > { %573 = vrot.lane.b32.xlu0 %v568_v30, %s816_s12  ;;  %551 = vrot.lane.b32.xlu2 %v546_v29, %s816_s12 }
 0x321   : > { %559 = vrot.lane.b32.xlu0 %v533_v18, %s818_s16 }
 0x36b   : > { %v572_v31 = vpop.permute.xlu2 %571 }
 0x36c   : > { %577 = vst.msk [vmem:[#allocation7] sm:$0xff] %vm270_vm3, %v572_v31 }
 0x373   : > { %v552_v32 = vpop.permute.xlu2 %551 }
 0x374   : > { %556 = vst.msk [vmem:[#allocation2 + $0x8] sm:$0xff] %vm270_vm3, %v552_v32 }
 0x381   : > { %v550_v33 = vpop.permute.xlu1 %549 }
 0x382   : > { %555 = vst.msk [vmem:[#allocation2] sm:$0xff] %vm270_vm3, %v550_v33 }
 0x389   : > { %v562_v34 = vpop.permute.xlu1 %561 }
 0x38a   : > { %566 = vst.msk [vmem:[#allocation3 + $0x8] sm:$0xff] %vm270_vm3, %v562_v34 }
 0x38b   : > { %v574_v35 = vpop.permute.xlu0 %573 }
 0x38c   : > { %578 = vst.msk [vmem:[#allocation7 + $0x8] sm:$0xff] %vm270_vm3, %v574_v35 }
 0x38d   : > { %692 = dma.vmem_to_hbm [thread:$0]  (%p701_p8), %s585_s19, 256, %s587_s23, [#allocation6], %s820_s24, %s820_s24, %s821_s25  }
 0x393   : > { %v560_v36 = vpop.permute.xlu0 %559 }
 0x394   : > { %565 = vst.msk [vmem:[#allocation3] sm:$0xff] %vm270_vm3, %v560_v36 }
 0x395   : > { %805 = dma.done.wait (%p701_p8), [#allocation6], 256  }
 0x396   : > { %807 = vsyncadd (%p701_p8), [#allocation6], 4294967040 }
 0x397 PF: > { %s17_s18 = sadd.s32 1, %s810_s18  }
 0x398   : > { %p14_p9 = scmp.ge.s32.totalorder %s17_s18, 8  }
 0x39a   :  { %16 = sbr.rel (!%p14_p9) target bundleno = 2 (0x2), region = 81 }
 0x39f   :  { %603 = vsyncpa [#allocation5], 1 }
 0x3a0   :  { %605 = vsyncpa [#allocation5 + $0x1], 1 }
 0x3a1   :  { %606 = vsyncpa [#allocation6], 1 }
 0x3a2   :  { %608 = vsyncpa [#allocation6 + $0x1], 1 }

</bundles_post_ra>
